<compile_context>
chip_gen: v7x
topology: tpu7x:2x2x1
jax: 0.10.0
libtpu: 0.0.40
codegen_flags: <defaults>
</compile_context>

<pallas_src>
import jax
import jax.numpy as jnp
from jax.experimental import pallas as pl
from jax.experimental.pallas import tpu as pltpu

BN_EPS = 1e-5


def critic_kernel(state_ref, action_ref,
                  w1_ref, gamma_ref, beta_ref,
                  w2s_ref, w2a_ref, b2_ref,
                  w3_ref, b3_ref,
                  out_ref):
    B = state_ref.shape[0]
    A = action_ref.shape[1]

    state = state_ref[...]                          # (B, S) f32
    action = action_ref[...]                        # (B, A) f32

    # ---- fcs1 (MXU, bf16 operands, f32 accumulate). Bias omitted: cancelled by BN. ----
    h1 = jnp.dot(state.astype(jnp.bfloat16), w1_ref[...],
                 preferred_element_type=jnp.float32)            # (B, 128) f32

    # ---- BatchNorm1d (train mode, biased batch stats), one-pass + folded affine ----
    inv_b = jnp.float32(1.0 / B)
    mean = jnp.sum(h1, axis=0, keepdims=True) * inv_b           # (1, 128)
    mean_sq = jnp.sum(h1 * h1, axis=0, keepdims=True) * inv_b   # (1, 128)
    var = mean_sq - mean * mean
    scale = gamma_ref[...] * jax.lax.rsqrt(var + BN_EPS)        # gamma / sqrt(var+eps)
    shift = beta_ref[...] - mean * scale                        # beta - mean*scale
    xs = jnp.maximum(h1 * scale + shift, 0.0)                   # relu(bn1(fcs1(state)))

    # ---- fc2 on cat([xs, action]) == xs @ W2[:128] + action @ W2[128:] + b2 ----
    # xs branch on the MXU (bf16 operands, f32 accumulate).
    h2 = jnp.dot(xs.astype(jnp.bfloat16), w2s_ref[...],
                 preferred_element_type=jnp.float32) + b2_ref[...]
    # action branch on the VPU: A (=4) unrolled broadcast FMAs, f32.
    for a in range(A):
        h2 = h2 + action[:, a:a + 1] * w2a_ref[a:a + 1, :]
    h2 = jnp.maximum(h2, 0.0)                                   # (B, 256) f32

    # ---- fc3 (N=1): VPU multiply + lane (XLU) reduction instead of a matmul ----
    out_ref[...] = (jnp.sum(h2 * w3_ref[...], axis=-1, keepdims=True)
                    + b3_ref[...])                              # (B, 1) f32


def critic_forward(state, action, params):
    B = state.shape[0]
    args = (state, action,
            params["w1"], params["gamma1"], params["beta1"],
            params["w2s"], params["w2a"], params["b2"],
            params["w3"], params["b3"])
    vmem = pl.BlockSpec(memory_space=pltpu.MemorySpace.VMEM)
    return pl.pallas_call(
        critic_kernel,
        out_shape=jax.ShapeDtypeStruct((B, 1), jnp.float32),
        in_specs=[vmem] * len(args),
        out_specs=vmem,
    )(*args)


def init_params(key, state_size, action_size, fcs1_units=128, fc2_units=256):
    """Deterministic init matching the PyTorch module's init scheme (shapes/ranges)."""
    ks = jax.random.split(key, 6)

    def uniform(k, shape, lim):
        return jax.random.uniform(k, shape, jnp.float32, -lim, lim)

    # fcs1: weight uniform(+/- 1/sqrt(weight.size()[0])), bias PyTorch default.
    lim1 = 1.0 / jnp.sqrt(jnp.float32(fcs1_units))
    w1 = uniform(ks[0], (state_size, fcs1_units), lim1)          # stored (in, out)
    b1 = uniform(ks[1], (1, fcs1_units), 1.0 / jnp.sqrt(jnp.float32(state_size)))

    # fc2
    lim2 = 1.0 / jnp.sqrt(jnp.float32(fc2_units))
    w2 = uniform(ks[2], (fcs1_units + action_size, fc2_units), lim2)
    b2 = uniform(ks[3], (1, fc2_units),
                 1.0 / jnp.sqrt(jnp.float32(fcs1_units + action_size)))

    # fc3: weight uniform(-3e-3, 3e-3), bias PyTorch default.
    w3 = uniform(ks[4], (1, fc2_units), 3e-3)                    # stored row-major (1, 256)
    b3 = uniform(ks[5], (1, 1), 1.0 / jnp.sqrt(jnp.float32(fc2_units)))

    return {
        "w1": w1.astype(jnp.bfloat16),                 # MXU operand -> bf16
        "b1": b1,                                      # kept for the reference only
        "gamma1": jnp.ones((1, fcs1_units), jnp.float32),
        "beta1": jnp.zeros((1, fcs1_units), jnp.float32),
        "w2s": w2[:fcs1_units, :].astype(jnp.bfloat16),  # rows acting on xs (MXU, bf16)
        "w2a": w2[fcs1_units:, :],                       # rows acting on action (VPU, f32)
        "b2": b2,
        "w3": w3, "b3": b3,
    }


def critic_reference(state, action, p):
    """Straightforward JAX mirror of the PyTorch forward (train-mode BN, with b1)."""
    h1 = jnp.dot(state.astype(jnp.bfloat16), p["w1"],
                 preferred_element_type=jnp.float32) + p["b1"]
    mean = jnp.mean(h1, axis=0, keepdims=True)
    var = jnp.mean((h1 - mean) ** 2, axis=0, keepdims=True)
    xs = jnp.maximum((h1 - mean) * jax.lax.rsqrt(var + BN_EPS) * p["gamma1"]
                     + p["beta1"], 0.0)
    # cat([xs, action]) @ W2 + b2, split by weight rows (exact concat equivalence)
    h2 = (jnp.dot(xs.astype(jnp.bfloat16), p["w2s"],
                  preferred_element_type=jnp.float32)
          + action @ p["w2a"] + p["b2"])
    h2 = jnp.maximum(h2, 0.0)
    return h2 @ p["w3"].T + p["b3"]


if __name__ == "__main__":
    # Reacher-like sizes, kept small: batch=8, state_size=33, action_size=4.
    B, STATE_SIZE, ACTION_SIZE = 8, 33, 4

    key = jax.random.PRNGKey(0)
    k_state, k_action, k_param = jax.random.split(key, 3)

    state = jax.random.normal(k_state, (B, STATE_SIZE), jnp.float32)
    action = jax.random.uniform(k_action, (B, ACTION_SIZE), jnp.float32, -1.0, 1.0)
    params = init_params(k_param, STATE_SIZE, ACTION_SIZE)

    q = critic_forward(state, action, params)
    q = jax.block_until_ready(q)

    q_ref = critic_reference(state, action, params)
    assert q.shape == (B, 1)
    assert jnp.allclose(q, q_ref, atol=2e-4, rtol=2e-4), (q, q_ref)

    print("KERNEL_OK")
</pallas_src>

<mosaic_0001>
module attributes {stable_mosaic.version = 11 : i64} {
  func.func @critic_kernel(%arg0: memref<8x33xf32, #tpu.memory_space<vmem>>, %arg1: memref<8x4xf32, #tpu.memory_space<vmem>>, %arg2: memref<33x128xbf16, #tpu.memory_space<vmem>>, %arg3: memref<1x128xf32, #tpu.memory_space<vmem>>, %arg4: memref<1x128xf32, #tpu.memory_space<vmem>>, %arg5: memref<128x256xbf16, #tpu.memory_space<vmem>>, %arg6: memref<4x256xf32, #tpu.memory_space<vmem>>, %arg7: memref<1x256xf32, #tpu.memory_space<vmem>>, %arg8: memref<1x256xf32, #tpu.memory_space<vmem>>, %arg9: memref<1x1xf32, #tpu.memory_space<vmem>>, %arg10: memref<8x1xf32, #tpu.memory_space<vmem>>) attributes {dimension_semantics = [], scalar_prefetch = 0 : i64, scratch_operands = 0 : i64, tpu.core_type = #tpu.core_type<tc>} {
    %c0 = arith.constant 0 : index
    %c0_0 = arith.constant 0 : index
    %0 = vector.load %arg0[%c0, %c0_0] : memref<8x33xf32, #tpu.memory_space<vmem>>, vector<8x33xf32>
    %c0_1 = arith.constant 0 : index
    %c0_2 = arith.constant 0 : index
    %1 = vector.load %arg1[%c0_1, %c0_2] : memref<8x4xf32, #tpu.memory_space<vmem>>, vector<8x4xf32>
    %2 = arith.truncf %0 : vector<8x33xf32> to vector<8x33xbf16>
    %c0_3 = arith.constant 0 : index
    %c0_4 = arith.constant 0 : index
    %3 = vector.load %arg2[%c0_3, %c0_4] : memref<33x128xbf16, #tpu.memory_space<vmem>>, vector<33x128xbf16>
    %cst = arith.constant dense<0.000000e+00> : vector<8x128xf32>
    %4 = tpu.matmul %2, %3, %cst {dimension_numbers = #tpu.dot_dimension_numbers<[1], [0], [0], [1], [0, 0, 1, 1], [], []>} : vector<8x33xbf16>, vector<33x128xbf16>, vector<8x128xf32> -> vector<8x128xf32>
    %cst_5 = arith.constant dense<0.000000e+00> : vector<128xf32>
    %5 = vector.multi_reduction <add>, %4, %cst_5 [0] : vector<8x128xf32> to vector<128xf32>
    %6 = vector.shape_cast %5 : vector<128xf32> to vector<1x128xf32>
    %cst_6 = arith.constant 1.250000e-01 : f32
    %7 = vector.broadcast %cst_6 : f32 to vector<1x128xf32>
    %8 = arith.mulf %6, %7 : vector<1x128xf32>
    %9 = arith.mulf %4, %4 : vector<8x128xf32>
    %cst_7 = arith.constant dense<0.000000e+00> : vector<128xf32>
    %10 = vector.multi_reduction <add>, %9, %cst_7 [0] : vector<8x128xf32> to vector<128xf32>
    %11 = vector.shape_cast %10 : vector<128xf32> to vector<1x128xf32>
    %cst_8 = arith.constant 1.250000e-01 : f32
    %12 = vector.broadcast %cst_8 : f32 to vector<1x128xf32>
    %13 = arith.mulf %11, %12 : vector<1x128xf32>
    %14 = arith.mulf %8, %8 : vector<1x128xf32>
    %15 = arith.subf %13, %14 : vector<1x128xf32>
    %c0_9 = arith.constant 0 : index
    %c0_10 = arith.constant 0 : index
    %16 = vector.load %arg3[%c0_9, %c0_10] : memref<1x128xf32, #tpu.memory_space<vmem>>, vector<1x128xf32>
    %cst_11 = arith.constant 9.99999974E-6 : f32
    %17 = vector.broadcast %cst_11 : f32 to vector<1x128xf32>
    %18 = arith.addf %15, %17 : vector<1x128xf32>
    %19 = math.rsqrt %18 : vector<1x128xf32>
    %20 = arith.mulf %16, %19 : vector<1x128xf32>
    %c0_12 = arith.constant 0 : index
    %c0_13 = arith.constant 0 : index
    %21 = vector.load %arg4[%c0_12, %c0_13] : memref<1x128xf32, #tpu.memory_space<vmem>>, vector<1x128xf32>
    %22 = arith.mulf %8, %20 : vector<1x128xf32>
    %23 = arith.subf %21, %22 : vector<1x128xf32>
    %24 = vector.broadcast %20 : vector<1x128xf32> to vector<8x128xf32>
    %25 = arith.mulf %4, %24 : vector<8x128xf32>
    %26 = vector.broadcast %23 : vector<1x128xf32> to vector<8x128xf32>
    %27 = arith.addf %25, %26 : vector<8x128xf32>
    %cst_14 = arith.constant 0.000000e+00 : f32
    %28 = vector.broadcast %cst_14 : f32 to vector<8x128xf32>
    %29 = arith.maximumf %27, %28 : vector<8x128xf32>
    %30 = arith.truncf %29 : vector<8x128xf32> to vector<8x128xbf16>
    %c0_15 = arith.constant 0 : index
    %c0_16 = arith.constant 0 : index
    %31 = vector.load %arg5[%c0_15, %c0_16] : memref<128x256xbf16, #tpu.memory_space<vmem>>, vector<128x256xbf16>
    %cst_17 = arith.constant dense<0.000000e+00> : vector<8x256xf32>
    %32 = tpu.matmul %30, %31, %cst_17 {dimension_numbers = #tpu.dot_dimension_numbers<[1], [0], [0], [1], [0, 0, 1, 1], [], []>} : vector<8x128xbf16>, vector<128x256xbf16>, vector<8x256xf32> -> vector<8x256xf32>
    %c0_18 = arith.constant 0 : index
    %c0_19 = arith.constant 0 : index
    %33 = vector.load %arg7[%c0_18, %c0_19] : memref<1x256xf32, #tpu.memory_space<vmem>>, vector<1x256xf32>
    %34 = vector.broadcast %33 : vector<1x256xf32> to vector<8x256xf32>
    %35 = arith.addf %32, %34 : vector<8x256xf32>
    %36 = vector.extract_strided_slice %1 {offsets = [0, 0], sizes = [8, 1], strides = [1, 1]} : vector<8x4xf32> to vector<8x1xf32>
    %c0_20 = arith.constant 0 : index
    %c0_21 = arith.constant 0 : index
    %37 = vector.load %arg6[%c0_20, %c0_21] : memref<4x256xf32, #tpu.memory_space<vmem>>, vector<1x256xf32>
    %38 = vector.broadcast %36 : vector<8x1xf32> to vector<8x256xf32>
    %39 = vector.broadcast %37 : vector<1x256xf32> to vector<8x256xf32>
    %40 = arith.mulf %38, %39 : vector<8x256xf32>
    %41 = arith.addf %35, %40 : vector<8x256xf32>
    %42 = vector.extract_strided_slice %1 {offsets = [0, 1], sizes = [8, 1], strides = [1, 1]} : vector<8x4xf32> to vector<8x1xf32>
    %c1 = arith.constant 1 : index
    %c0_22 = arith.constant 0 : index
    %43 = vector.load %arg6[%c1, %c0_22] : memref<4x256xf32, #tpu.memory_space<vmem>>, vector<1x256xf32>
    %44 = vector.broadcast %42 : vector<8x1xf32> to vector<8x256xf32>
    %45 = vector.broadcast %43 : vector<1x256xf32> to vector<8x256xf32>
    %46 = arith.mulf %44, %45 : vector<8x256xf32>
    %47 = arith.addf %41, %46 : vector<8x256xf32>
    %48 = vector.extract_strided_slice %1 {offsets = [0, 2], sizes = [8, 1], strides = [1, 1]} : vector<8x4xf32> to vector<8x1xf32>
    %c2 = arith.constant 2 : index
    %c0_23 = arith.constant 0 : index
    %49 = vector.load %arg6[%c2, %c0_23] : memref<4x256xf32, #tpu.memory_space<vmem>>, vector<1x256xf32>
    %50 = vector.broadcast %48 : vector<8x1xf32> to vector<8x256xf32>
    %51 = vector.broadcast %49 : vector<1x256xf32> to vector<8x256xf32>
    %52 = arith.mulf %50, %51 : vector<8x256xf32>
    %53 = arith.addf %47, %52 : vector<8x256xf32>
    %54 = vector.extract_strided_slice %1 {offsets = [0, 3], sizes = [8, 1], strides = [1, 1]} : vector<8x4xf32> to vector<8x1xf32>
    %c3 = arith.constant 3 : index
    %c0_24 = arith.constant 0 : index
    %55 = vector.load %arg6[%c3, %c0_24] : memref<4x256xf32, #tpu.memory_space<vmem>>, vector<1x256xf32>
    %56 = vector.broadcast %54 : vector<8x1xf32> to vector<8x256xf32>
    %57 = vector.broadcast %55 : vector<1x256xf32> to vector<8x256xf32>
    %58 = arith.mulf %56, %57 : vector<8x256xf32>
    %59 = arith.addf %53, %58 : vector<8x256xf32>
    %cst_25 = arith.constant 0.000000e+00 : f32
    %60 = vector.broadcast %cst_25 : f32 to vector<8x256xf32>
    %61 = arith.maximumf %59, %60 : vector<8x256xf32>
    %c0_26 = arith.constant 0 : index
    %c0_27 = arith.constant 0 : index
    %62 = vector.load %arg8[%c0_26, %c0_27] : memref<1x256xf32, #tpu.memory_space<vmem>>, vector<1x256xf32>
    %63 = vector.broadcast %62 : vector<1x256xf32> to vector<8x256xf32>
    %64 = arith.mulf %61, %63 : vector<8x256xf32>
    %cst_28 = arith.constant dense<0.000000e+00> : vector<8xf32>
    %65 = vector.multi_reduction <add>, %64, %cst_28 [1] : vector<8x256xf32> to vector<8xf32>
    %66 = vector.shape_cast %65 : vector<8xf32> to vector<8x1xf32>
    %c0_29 = arith.constant 0 : index
    %c0_30 = arith.constant 0 : index
    %67 = vector.load %arg9[%c0_29, %c0_30] : memref<1x1xf32, #tpu.memory_space<vmem>>, vector<1x1xf32>
    %68 = vector.broadcast %67 : vector<1x1xf32> to vector<8x1xf32>
    %69 = arith.addf %66, %68 : vector<8x1xf32>
    %c0_31 = arith.constant 0 : index
    %c0_32 = arith.constant 0 : index
    %70 = vector.load %arg10[%c0_31, %c0_32] : memref<8x1xf32, #tpu.memory_space<vmem>>, vector<8x1xf32>
    tpu.vector_store %arg10[%c0_31, %c0_32], %69 {strides = array<i32>} : memref<8x1xf32, #tpu.memory_space<vmem>>, vector<8x1xf32>,
    return
  }
}

</mosaic_0001>

<bundles_post_ra>
// kernel: tpu_custom_call.1
= control target key start
LH: loop header
LB: loop body
LE: loop exit
PB: predicated region body
PF: predicated region fallthrough
CT: control target
= control target key end

     0   :  { %s805_s0 = inlined_call_operand.hbm [shape: f32[8,33], index: 0, kind: input, shape index: {}]   ;;  %s806_s1 = inlined_call_operand.vmem [shape: f32[8,4], index: 1, kind: input, shape index: {}]   ;;  %s807_s2 = inlined_call_operand.vmem [shape: bf16[33,128], index: 2, kind: input, shape index: {}]   ;;  %s808_s3 = inlined_call_operand.hbm [shape: f32[1,128], index: 3, kind: input, shape index: {}]   ;;  %s809_s4 = inlined_call_operand.hbm [shape: f32[1,128], index: 4, kind: input, shape index: {}]   ;;  %s810_s5 = inlined_call_operand.hbm [shape: bf16[128,256], index: 5, kind: input, shape index: {}]   ;;  %s811_s6 = inlined_call_operand.vmem [shape: f32[4,256], index: 6, kind: input, shape index: {}]   ;;  %s812_s7 = inlined_call_operand.vmem [shape: f32[1,256], index: 7, kind: input, shape index: {}]   ;;  %s813_s8 = inlined_call_operand.vmem [shape: f32[1,256], index: 8, kind: input, shape index: {}]   ;;  %s814_s9 = inlined_call_operand.<no memory space> [shape: f32[1,1], index: 9, kind: input, shape index: {}]   ;;  %s815_s10 = inlined_call_operand.vmem [shape: f32[8,1], index: 10, kind: output, shape index: {}]  }
   0x1   :  { %v15_v0 = vstv %s814_s9 }
   0x2   :  { %16 = vst [vmem:[#allocation2] sm:$0x1] %v15_v0 }
   0x3   :  { %17 = vsyncpa [#allocation4], 0 }
   0x4   :  { %18 = vsyncpa [#allocation6], 0 }
   0x5   :  { %19 = vsyncpa [#allocation9], 0  ;;  %s647_s15 = smov [#allocation5]   ;;  %s648_s17 = smov [#allocation3]  }
   0x6   :  { %s40_s16 = sshll.u32 %s647_s15, 4  ;;  %s26_s18 = sshll.u32 %s648_s17, 4  ;;  %s41_s16 = int_to_ptr.vmem [resolvable:$true] %s40_s16  ;;  %s27_s18 = int_to_ptr.vmem [resolvable:$true] %s26_s18 }
   0x7   :  { %s553_s21 = scalar_lea.hbm %s808_s3, 16 }
   0x8   :  { %p554_p0 = scmp.ne.s32.totalorder %s808_s3, %s553_s21  ;;  %p557_p1 = scmp.lt.u32.totalorder %s553_s21, %s808_s3 }
   0xa   :  { %p559_p2 = pnand %p557_p1, %p554_p0 }
   0xc   :  { %562 = shalt.err (!%p559_p2)
}
   0xd   :  { %s563_s25 = scalar_lea.vmem %s41_s16, 16  ;;  %s567_s26 = scalar_lea.vmem %s41_s16, 32 }
   0xe   :  { %p564_p3 = scmp.ne.s32.totalorder %s41_s16, %s563_s25  ;;  %p568_p4 = scmp.lt.s32.totalorder %s41_s16, %s41_s16 }
   0xf   :  { %p569_p5 = scmp.lt.s32.totalorder %s567_s26, %s563_s25 }
  0x11   :  { %p570_p6 = por %p569_p5, %p568_p4 }
  0x13   :  { %p571_p7 = pnand %p570_p6, %p564_p3 }
  0x15   :  { %574 = shalt.err (!%p571_p7)
}
  0x16   :  { %43 = dma.hbm_to_vmem [thread:$0]  %s808_s3, 16, %s41_s16, [#allocation6]  }
  0x17   :  { %s575_s11 = scalar_lea.hbm %s805_s0, 128 }
  0x18   :  { %p576_p8 = scmp.ne.s32.totalorder %s805_s0, %s575_s11  ;;  %p579_p9 = scmp.lt.u32.totalorder %s575_s11, %s805_s0 }
  0x1a   :  { %p581_p10 = pnand %p579_p9, %p576_p8 }
  0x1c   :  { %584 = shalt.err (!%p581_p10)
}
  0x1d   :  { %s585_s17 = scalar_lea.vmem %s27_s18, 128  ;;  %p590_p12 = scmp.lt.s32.totalorder %s27_s18, %s27_s18 }
  0x1e   :  { %p586_p11 = scmp.ne.s32.totalorder %s27_s18, %s585_s17  ;;  %p591_p13 = scmp.lt.s32.totalorder %s585_s17, %s585_s17 }
  0x20   :  { %p592_p0 = por %p591_p13, %p590_p12 }
  0x22   :  { %p593_p1 = pnand %p592_p0, %p586_p11 }
  0x24   :  { %596 = shalt.err (!%p593_p1)
}
  0x25   :  { %29 = dma.hbm_to_vmem [thread:$0]  %s805_s0, 128, %s27_s18, [#allocation4]  }
  0x26   :  { %s649_s19 = smov [#allocation7]   ;;  %s650_s21 = smov [#allocation8]  }
  0x27   :  { %s50_s20 = sshll.u32 %s649_s19, 4  ;;  %s59_s22 = sshll.u32 %s650_s21, 4  ;;  %s51_s20 = int_to_ptr.vmem [resolvable:$true] %s50_s20  ;;  %s741_s22 = int_to_ptr.vmem [resolvable:$true] %s59_s22 }
  0x28   :  { %s597_s9 = scalar_lea.hbm %s809_s4, 16 }
  0x29   :  { %p598_p2 = scmp.ne.s32.totalorder %s809_s4, %s597_s9  ;;  %p601_p3 = scmp.lt.u32.totalorder %s597_s9, %s809_s4 }
  0x2b   :  { %p603_p4 = pnand %p601_p3, %p598_p2 }
  0x2d   :  { %606 = shalt.err (!%p603_p4)
}
  0x2e   :  { %s607_s0 = scalar_lea.vmem %s51_s20, 16  ;;  %s611_s18 = scalar_lea.vmem %s51_s20, 32 }
  0x2f   :  { %p608_p5 = scmp.ne.s32.totalorder %s51_s20, %s607_s0  ;;  %p612_p6 = scmp.lt.s32.totalorder %s51_s20, %s51_s20 }
  0x30   :  { %p613_p7 = scmp.lt.s32.totalorder %s611_s18, %s607_s0 }
  0x32   :  { %p614_p8 = por %p613_p7, %p612_p6 }
  0x34   :  { %p615_p9 = pnand %p614_p8, %p608_p5 }
  0x36   :  { %618 = shalt.err (!%p615_p9)
}
  0x37   :  { %53 = dma.hbm_to_vmem [thread:$0]  %s809_s4, 16, %s51_s20, [#allocation6]  }
  0x38   :  { %s619_s13 = scalar_lea.hbm %s810_s5, 2048 }
  0x39   :  { %p620_p10 = scmp.ne.s32.totalorder %s810_s5, %s619_s13  ;;  %p623_p11 = scmp.lt.u32.totalorder %s619_s13, %s810_s5 }
  0x3b   :  { %p625_p12 = pnand %p623_p11, %p620_p10 }
  0x3d   :  { %628 = shalt.err (!%p625_p12)
}
  0x3e   :  { %s629_s16 = scalar_lea.vmem %s741_s22, 2048  ;;  %p634_p0 = scmp.lt.s32.totalorder %s741_s22, %s741_s22 }
  0x3f   :  { %p630_p13 = scmp.ne.s32.totalorder %s741_s22, %s629_s16  ;;  %p635_p1 = scmp.lt.s32.totalorder %s629_s16, %s629_s16 }
  0x41   :  { %p636_p2 = por %p635_p1, %p634_p0 }
  0x43   :  { %p637_p3 = pnand %p636_p2, %p630_p13 }
  0x45   :  { %640 = shalt.err (!%p637_p3)
}
  0x46   :  { %s651_s4 = smov 128   ;;  %s652_s19 = smov 8  }
  0x47   :  { %65 = dma.hbm_to_vmem [thread:$0]  %s810_s5, 2048, %s741_s22, [#allocation9], %s651_s4, %s651_s4, %s652_s19  }
  0x48   :  { %641 = dma.done.wait [#allocation4], 128  }
  0x49   :  { %642 = vsyncadd [#allocation4], 4294967168 }
  0x4a   :  { %643 = dma.done.wait [#allocation6], 32  }
  0x4b   :  { %644 = vsyncadd [#allocation6], 4294967264 }
  0x4c   :  { %645 = dma.done.wait [#allocation9], 2048  }
  0x4d   :  { %646 = vsyncadd [#allocation9], 4294965248  ;;  %v653_v1 = vmov 0.0   ;;  %vm654_vm0 = vmmov 0   ;;  %v655_v2 = vmov 0   ;;  %v524_v3 = vld [vmem:[%s807_s2] sm:$0xff]   ;;  %v185_v52 = vlaneseq }
  0x4e   :  { %497 = vmatprep.subr.bf16.mxu0 %v653_v1  ;;  %503 = vmatprep.mubr.msk.bf16.mxu0 %vm654_vm0, %v653_v1  ;;  %vm114_vm1 = vcmask 1040384   ;;  %v525_v4 = vld [vmem:[%s807_s2 + $0x8] sm:$0xff]   ;;  %v526_v5 = vld [vmem:[%s807_s2 + $0x10] ss:$0 sps:$4 sm:$0x11]   ;;  %vm110_vm2 = vcmask 269312  }
  0x4f   :  { %340 = vmatprep.mubr.bf16.mxu1 %v655_v2  ;;  %519 = vset.pattern.permute.xlu0 %v655_v2  ;;  %v116_v6 = vsel %vm114_vm1, 65535, %v655_v2  ;;  %v87_v7 = vld [vmem:[#allocation3] sm:$0xff]  ;;  %v527_v10 = vld [vmem:[#allocation8 + $0x4] ss:$8 sps:$4 sm:$0xff]   ;;  %v529_v11 = vld [vmem:[#allocation8] ss:$8 sps:$4 sm:$0xff]  }
  0x50   :  { %498 = vmatpush3.bf16.msra.mxu0 %v524_v3  ;;  %v118_v8 = vand.u32 %v526_v5, %v116_v6  ;;  %v89_v9 = vpack.c.bf16 %v87_v7, %v87_v7  ;;  %308 = vmatprep.subr.bf16.mxu1 %v527_v10  ;;  %v530_v12 = vld [vmem:[#allocation8 + $0x14] ss:$8 sps:$4 sm:$0xff]   ;;  %v532_v13 = vld [vmem:[#allocation8 + $0x10] ss:$8 sps:$4 sm:$0xff]   ;;  %v533_v14 = vld [vmem:[#allocation8 + $0x24] ss:$8 sps:$4 sm:$0xff]  }
  0x51   :  { %499 = vmatprep.subr.bf16.mxu0 %v653_v1  ;;  %309 = vmatpush1.bf16.msra.mxu1 %v529_v11  ;;  %v535_v15 = vld [vmem:[#allocation8 + $0x20] ss:$8 sps:$4 sm:$0xff]   ;;  %v536_v16 = vld [vmem:[#allocation8 + $0x34] ss:$8 sps:$4 sm:$0xff]   ;;  %v538_v17 = vld [vmem:[#allocation8 + $0x30] ss:$8 sps:$4 sm:$0xff]  }
  0x52   :  { %310 = vmatprep.subr.bf16.mxu1 %v530_v12  ;;  %v539_v18 = vld [vmem:[#allocation8 + $0x44] ss:$8 sps:$4 sm:$0xff]   ;;  %v541_v19 = vld [vmem:[#allocation8 + $0x40] ss:$8 sps:$4 sm:$0xff]   ;;  %v542_v20 = vld [vmem:[#allocation8 + $0x54] ss:$8 sps:$4 sm:$0xff]  }
  0x53   :  { %v544_v21 = vld [vmem:[#allocation8 + $0x50] ss:$8 sps:$4 sm:$0xff]   ;;  %v545_v22 = vld [vmem:[#allocation8 + $0x64] ss:$8 sps:$4 sm:$0xff]   ;;  %v547_v23 = vld [vmem:[#allocation8 + $0x60] ss:$8 sps:$4 sm:$0xff]  }
  0x54   :  { %500 = vmatpush3.bf16.msra.mxu0 %v525_v4  ;;  %v548_v24 = vld [vmem:[#allocation8 + $0x74] ss:$8 sps:$4 sm:$0xff]   ;;  %v550_v25 = vld [vmem:[#allocation8 + $0x70] ss:$8 sps:$4 sm:$0xff]   ;;  %v656_v27 = vmov 2   ;;  %v657_v28 = vmov 1  }
  0x55   :  { %501 = vmatprep.subr.bf16.mxu0 %v653_v1  ;;  %311 = vmatpush1.bf16.msra.mxu1 %v532_v13  ;;  %v88_v26 = vld [vmem:[%s806_s1] sm:$0xff]  ;;  %v658_v29 = vmov 3   ;;  %v186_v53 = vshrl.u32 %v185_v52, 7  ;;  %v177_v54 = vld [vmem:[#allocation5] sm:$0x1]  ;;  %vm460_vm3 = vcmask 7168  }
  0x56   :  { %312 = vmatprep.subr.bf16.mxu1 %v533_v14  ;;  %352 = vperm.xlu0 %519, %v88_v26   ;;  %v181_v58 = vld [vmem:[#allocation7] sm:$0x1]  ;;  %v349_v5 = vld [vmem:[%s811_s6] ss:$4 sm:$0x3] }
  0x57   :  { %521 = vset.pattern.permute.xlu1 %v656_v27  ;;  %v187_v55 = vsub.s32 0, %v186_v53  ;;  %v224_v3 = vsub.s32 1, %v186_v53  ;;  %v216_v6 = vld [vmem:[%s812_s7] sm:$0x3] }
  0x58   :  { %502 = vmatpush3.bf16.msra.mxu0 %v118_v8  ;;  %394 = vperm.xlu1 %521, %v88_v26   ;;  %v489_v7 = vld [vmem:[%s811_s6 + $0x1] ss:$4 sm:$0x3]  ;;  %v490_v14 = vld [vmem:[%s811_s6 + $0x2] ss:$4 sm:$0x3] }
  0x59   :  { %313 = vmatpush1.bf16.msra.mxu1 %v535_v15  ;;  %v359_v8 = vrot.slane %v349_v5, %v187_v55  ;;  %v221_v11 = vrot.slane %v216_v6, %v187_v55  ;;  %v380_v12 = vrot.slane %v489_v7, %v187_v55  ;;  %v225_v13 = vrot.slane %v216_v6, %v224_v3  ;;  %v492_v53 = vld [vmem:[#allocation2] ss:$0 sm:$0xff] }
  0x5a   :  { %314 = vmatprep.subr.bf16.mxu1 %v536_v16  ;;  %520 = vset.pattern.permute.xlu0 %v657_v28  ;;  %v384_v15 = vrot.slane %v489_v7, %v224_v3  ;;  %v405_v27 = vrot.slane %v490_v14, %v224_v3 }
  0x5b   :  { %504 = vmatmul.mubr.msk.bf16.vlgmr.msra.gmra.mrb[0].mxu0 %vm110_vm2, %v89_v9  ;;  %373 = vperm.xlu0 %520, %v88_v26   ;;  %v363_v9 = vrot.slane %v349_v5, %v224_v3 }
  0x5c   :  { %522 = vset.pattern.permute.xlu1 %v658_v29 }
  0x5d   :  { %315 = vmatpush1.bf16.msra.mxu1 %v538_v17  ;;  %415 = vperm.xlu1 %522, %v88_v26   ;;  %v491_v17 = vld [vmem:[%s811_s6 + $0x3] ss:$4 sm:$0x3] }
  0x5e   :  { %316 = vmatprep.subr.bf16.mxu1 %v539_v18 }
  0x5f   :  { %523 = vset.pattern.permute.xlu0 %v658_v29 }
  0x61   :  { %317 = vmatpush1.bf16.msra.mxu1 %v541_v19 }
  0x62   :  { %318 = vmatprep.subr.bf16.mxu1 %v542_v20 }
  0x65   :  { %319 = vmatpush1.bf16.msra.mxu1 %v544_v21 }
  0x66   :  { %320 = vmatprep.subr.bf16.mxu1 %v545_v22 }
  0x69   :  { %321 = vmatpush1.bf16.msra.mxu1 %v547_v23  ;;  %v401_v23 = vrot.slane %v490_v14, %v187_v55 }
  0x6a   :  { %322 = vmatprep.subr.bf16.mxu1 %v548_v24 }
  0x6d   :  { %323 = vmatpush1.bf16.msra.mxu1 %v550_v25  ;;  %v422_v25 = vrot.slane %v491_v17, %v187_v55 }
  0xd5   :  { %v353_v4 = vpop.permute.xlu0 %352 }
  0xd6   :  { %v366_v18 = vmul.f32 %v359_v8, %v353_v4  ;;  %v367_v19 = vmul.f32 %v363_v9, %v353_v4 }
  0xd7   :  { %v395_v10 = vpop.permute.xlu1 %394 }
  0xda   :  { %v374_v16 = vpop.permute.xlu0 %373 }
  0xdb   :  { %v387_v24 = vmul.f32 %v380_v12, %v374_v16  ;;  %v388_v28 = vmul.f32 %v384_v15, %v374_v16 }
 0x12e   :  { %v154_v30 = vpop.f32.mrb[0].mxu0 }
 0x12f   :  { %v160_v31 = vrot.slane %v154_v30, 4  ;;  %v167_v32 = vmul.f32 %v154_v30, %v154_v30  ;;  %v505_v33 = vpop.f32.mrb[1].mxu0 }
 0x130   :  { %v157_v34 = vpop.f32.mrb[2].mxu0 }
 0x131   :  { %v161_v35 = vadd.f32 %v160_v31, %v154_v30  ;;  %v168_v36 = vrot.slane %v167_v32, 4  ;;  %v506_v37 = vpop.f32.mrb[3].mxu0  ;;  %v416_v31 = vpop.permute.xlu1 %415 }
 0x132   :  { %v429_v37 = vmul.f32 %v422_v25, %v416_v31 }
 0x133   :  { %v162_v38 = vrot.slane %v161_v35, 2  ;;  %v169_v39 = vadd.f32 %v168_v36, %v167_v32 }
 0x135   :  { %v163_v40 = vadd.f32 %v162_v38, %v161_v35  ;;  %v170_v41 = vrot.slane %v169_v39, 2  ;;  %v408_v35 = vmul.f32 %v401_v23, %v395_v10  ;;  %v409_v38 = vmul.f32 %v405_v27, %v395_v10 }
 0x137   :  { %v164_v42 = vrot.slane %v163_v40, 1  ;;  %v171_v43 = vadd.f32 %v170_v41, %v169_v39  ;;  %v435_v41 = vld [vmem:[%s813_s8] sm:$0x3] }
 0x139   :  { %v165_v44 = vadd.f32 %v164_v42, %v163_v40  ;;  %v172_v45 = vrot.slane %v171_v43, 1 }
 0x13b   :  { %v166_v46 = vmul.f32 0.125, %v165_v44  ;;  %v173_v47 = vadd.f32 %v172_v45, %v171_v43  ;;  %v440_v45 = vrot.slane %v435_v41, %v187_v55 }
 0x13d   :  { %v174_v48 = vmul.f32 0.125, %v173_v47  ;;  %v175_v49 = vmul.f32 %v166_v46, %v166_v46  ;;  %v444_v47 = vrot.slane %v435_v41, %v224_v3 }
 0x13f   :  { %v176_v50 = vsub.f32 %v174_v48, %v175_v49 }
 0x141   :  { %v178_v51 = vadd.f32 1e-05, %v176_v50 }
 0x143   :  { %551 = vrsqrt.f32 %v178_v51 }
 0x14d   :  { %v552_v56 = vpop.eup %551 }
 0x14e   :  { %v180_v57 = vmul.f32 %v552_v56, %v177_v54 }
 0x150   :  { %v188_v59 = vrot.slane %v180_v57, %v187_v55  ;;  %v182_v60 = vmul.f32 %v180_v57, %v166_v46 }
 0x152   :  { %v183_v61 = vsub.f32 %v181_v58, %v182_v60  ;;  %v190_v62 = vmul.f32 %v188_v59, %v154_v30  ;;  %v426_v30 = vrot.slane %v491_v17, %v224_v3 }
 0x154   :  { %v195_v63 = vrot.slane %v183_v61, %v187_v55  ;;  %v430_v40 = vmul.f32 %v426_v30, %v416_v31 }
 0x156   :  { %v197_v0 = vadd.f32 %v195_v63, %v190_v62 }
 0x158   :  { %v198_v1 = vmax.f32 %v197_v0, 0.0 }
 0x15a   :  { %v199_v2 = vpack.c.bf16 %v198_v1, %v198_v1 }
 0x15c   :  { %341 = vmatmul.mubr.bf16.vlgmr.msra.gmra.mrb[0].mxu1 %v199_v2 }
 0x22f   :  { %v342_v20 = vpop.f32.mrb[0].mxu1 }
 0x230   :  { %v343_v21 = vadd.f32 %v342_v20, %v221_v11  ;;  %v344_v22 = vpop.f32.mrb[1].mxu1 }
 0x231   :  { %v345_v26 = vadd.f32 %v344_v22, %v225_v13  ;;  %v346_v29 = vpop.f32.mrb[2].mxu1 }
 0x232   :  { %v368_v32 = vadd.f32 %v366_v18, %v343_v21  ;;  %v347_v33 = vpop.f32.mrb[3].mxu1 }
 0x233   :  { %v369_v34 = vadd.f32 %v367_v19, %v345_v26 }
 0x234   :  { %v389_v36 = vadd.f32 %v387_v24, %v368_v32 }
 0x235   :  { %v390_v39 = vadd.f32 %v388_v28, %v369_v34 }
 0x236   :  { %v410_v42 = vadd.f32 %v408_v35, %v389_v36 }
 0x237   :  { %v411_v43 = vadd.f32 %v409_v38, %v390_v39 }
 0x238   :  { %v431_v44 = vadd.f32 %v429_v37, %v410_v42 }
 0x239   :  { %v432_v46 = vadd.f32 %v430_v40, %v411_v43 }
 0x23a   :  { %v433_v48 = vmax.f32 %v431_v44, 0.0 }
 0x23b   :  { %v434_v49 = vmax.f32 %v432_v46, 0.0 }
 0x23c   :  { %v447_v50 = vmul.f32 %v440_v45, %v433_v48 }
 0x23d   :  { %v448_v51 = vmul.f32 %v444_v47, %v434_v49 }
 0x23f   :  { %v449_v52 = vadd.f32 %v448_v51, %v447_v50 }
 0x241   :  { %450 = vadd.xlane.f32.xlu1 %v449_v52 }
 0x2ce   :  { %v451_v54 = vpop.xlane.xlu1 %450 }
 0x2cf   :  { %v459_v56 = vadd.f32 %v492_v53, %v451_v54 }
 0x2d1   :  { %461 = vst.msk [vmem:[%s815_s10] sm:$0xff] %vm460_vm3, %v459_v56 }
 0x2d2   :  { %466 = vsyncpa [#allocation4], 1 }
 0x2d3   :  { %467 = vsyncpa [#allocation6], 1 }
 0x2d4   :  { %468 = vsyncpa [#allocation9], 1 }

</bundles_post_ra>
